<compile_context>
chip_gen: v7x
topology: tpu7x:2x2x1
jax: 0.10.0
libtpu: 0.0.40
codegen_flags: <defaults>
</compile_context>

<pallas_src>
import functools

import jax
import jax.numpy as jnp
from jax.experimental import pallas as pl
from jax.experimental.pallas import tpu as pltpu


def gin_conv_kernel(eps_ref, adj_ref, x_ref, wt_ref, b_ref, o_ref, acc_ref,
                    *, tile, x_resident):
    # eps_ref: (1,)              scalar eps in SMEM
    # adj_ref: (tile, tile)      adjacency block (row block i, col block k), caller dtype
    # x_ref:   (N, nfeat) if x_resident else (tile, nfeat), f32
    # wt_ref:  (nfeat, nhid_pad) Linear weight, transposed + lane-padded, f32
    # b_ref:   (1, nhid_pad)     Linear bias, lane-padded, f32
    # o_ref:   (tile, nhid_pad)  output row block
    # acc_ref: (tile, nfeat)     f32 VMEM accumulator for (eps*x + adj@x), persists over k
    i = pl.program_id(0)
    k = pl.program_id(1)

    @pl.when(k == 0)
    def _init():
        acc_ref[...] = jnp.zeros_like(acc_ref)

    if x_resident:
        start = pl.multiple_of(k * tile, tile)
        x_blk = x_ref[pl.ds(start, tile), :]
    else:
        x_blk = x_ref[...]

    # Aggregation partial sum on the native bf16 MXU path, f32 accumulate.
    # adj downcast is exact for 0/1 entries; only x rounds to bf16 here.
    acc_ref[...] += jnp.dot(adj_ref[...].astype(jnp.bfloat16),
                            x_blk.astype(jnp.bfloat16),
                            preferred_element_type=jnp.float32)

    # eps * x self-term: with tile_m == tile_k, the k-th x block IS row block i when
    # k == i.  Uses the f32 x, so this term is exact.
    @pl.when(k == i)
    def _self_term():
        acc_ref[...] += eps_ref[0] * x_blk

    # Finalize: project with the (lane-padded) Linear layer and store lane-dense.
    @pl.when(k == pl.num_programs(1) - 1)
    def _finalize():
        out = jnp.dot(acc_ref[...], wt_ref[...],
                      preferred_element_type=jnp.float32) + b_ref[...]
        o_ref[...] = out.astype(o_ref.dtype)


def _pick_tile(n):
    if n % 128 != 0:
        # TODO(synk): ragged N (not a multiple of 128) would need masking / pl.BoundedSlice.
        raise ValueError(f"N={n} must be a multiple of 128")
    candidates = [t for t in (1024, 512, 256, 128) if n % t == 0]
    # Largest tile that still leaves an even number (>= 2) of row blocks, so both
    # v7x TensorCores get balanced work via the "parallel" row axis.
    for t in candidates:
        if (n // t) >= 2 and (n // t) % 2 == 0:
            return t
    for t in candidates:
        if (n // t) >= 2:
            return t
    return candidates[0]          # n == 128: single row block


@functools.partial(jax.jit, static_argnames=("tile",))
def gin_conv(adj, x, w, b, eps, *, tile=None):
    """adj: [N, N] (f32; or bf16 if pre-cast once by the caller), x: [N, nfeat],
    w: [nhid, nfeat], b: [nhid], eps: [1]  ->  [N, nhid]."""
    N, nfeat = x.shape
    nhid = w.shape[0]
    if tile is None:
        tile = _pick_tile(N)
    assert N % tile == 0

    # Lane-dense (multiple-of-128) projection width; padding sliced off after the call.
    nhid_pad = ((nhid + 127) // 128) * 128
    w_t = jnp.zeros((nfeat, nhid_pad), x.dtype).at[:, :nhid].set(w.T)
    b_pad = jnp.zeros((1, nhid_pad), x.dtype).at[0, :nhid].set(b)

    n_row = N // tile
    n_k = N // tile

    # Keep x fully VMEM-resident when small (removes the per-row-block re-stream);
    # the 4 MiB cap leaves headroom next to the double-buffered adjacency on v7x.
    x_bytes = N * nfeat * x.dtype.itemsize
    x_resident = x_bytes <= 4 * 1024 * 1024
    if x_resident:
        x_spec = pl.BlockSpec((N, nfeat), lambda i, k: (0, 0))
    else:
        x_spec = pl.BlockSpec((tile, nfeat), lambda i, k: (k, 0))

    # Advisory cost estimate (aggregation + projection flops; dominant HBM streams).
    flops = 2 * N * N * nfeat + 2 * N * nfeat * nhid_pad
    bytes_accessed = (N * N * adj.dtype.itemsize                    # adjacency stream
                      + (1 if x_resident else n_row) * x_bytes      # x
                      + N * nhid_pad * 4                            # output
                      + nfeat * nhid_pad * 4)                       # weight

    kernel = functools.partial(gin_conv_kernel, tile=tile, x_resident=x_resident)

    out_pad = pl.pallas_call(
        kernel,
        out_shape=jax.ShapeDtypeStruct((N, nhid_pad), x.dtype),
        grid_spec=pltpu.PrefetchScalarGridSpec(
            num_scalar_prefetch=0,
            grid=(n_row, n_k),
            in_specs=[
                pl.BlockSpec(memory_space=pltpu.SMEM),                 # eps (1,)
                pl.BlockSpec((tile, tile), lambda i, k: (i, k)),       # adj block
                x_spec,                                                # x (resident or k-block)
                pl.BlockSpec((nfeat, nhid_pad), lambda i, k: (0, 0)),  # W^T (padded)
                pl.BlockSpec((1, nhid_pad), lambda i, k: (0, 0)),      # bias (padded)
            ],
            out_specs=pl.BlockSpec((tile, nhid_pad), lambda i, k: (i, 0)),
            scratch_shapes=[pltpu.VMEM((tile, nfeat), jnp.float32)],   # agg accumulator
        ),
        compiler_params=pltpu.CompilerParams(
            dimension_semantics=("parallel", "arbitrary"),
            vmem_limit_bytes=48 * 1024 * 1024,   # above scoped defaults, under v7x's 64 MiB
        ),
        cost_estimate=pl.CostEstimate(
            flops=flops, transcendentals=0, bytes_accessed=bytes_accessed),
    )(eps, adj, x, w_t, b_pad)

    return out_pad[:, :nhid]


if __name__ == "__main__":
    # Small deterministic problem: N nodes, nfeat input features, nhid hidden.
    # N = 256 -> tile 128 -> (2, 2) grid: 2 parallel row blocks and 2 k steps.
    N, nfeat, nhid = 256, 64, 32
    key = jax.random.PRNGKey(0)
    k_adj, k_x, k_w, k_b = jax.random.split(key, 4)

    adj = (jax.random.uniform(k_adj, (N, N), jnp.float32) < 0.1).astype(jnp.float32)
    x = jax.random.normal(k_x, (N, nfeat), jnp.float32)

    # nn.Linear(nfeat, nhid) init: uniform(-1/sqrt(nfeat), 1/sqrt(nfeat))
    bound = 1.0 / (nfeat ** 0.5)
    w = jax.random.uniform(k_w, (nhid, nfeat), jnp.float32, -bound, bound)
    b = jax.random.uniform(k_b, (nhid,), jnp.float32, -bound, bound)
    # eps initialized to 0.0, exactly as in the module's __init__
    eps = jnp.array([0.0], dtype=jnp.float32)

    out = jax.block_until_ready(gin_conv(adj, x, w, b, eps))
    assert out.shape == (N, nhid)

    hp = jax.lax.Precision.HIGHEST

    # Tight check: kernel should match a reference with the same intentional bf16
    # rounding of x inside the aggregation; everything else is f32.
    x_bf = x.astype(jnp.bfloat16).astype(jnp.float32)
    ref_bf = jnp.dot(eps[0] * x + jnp.dot(adj, x_bf, precision=hp), w.T, precision=hp) + b
    assert jnp.allclose(out, ref_bf, atol=1e-3, rtol=1e-3), (
        float(jnp.max(jnp.abs(out - ref_bf))))

    # Loose sanity check against the exact f32 PyTorch forward (bf16 x rounding only).
    ref = jnp.dot(eps[0] * x + jnp.dot(adj, x, precision=hp), w.T, precision=hp) + b
    assert jnp.allclose(out, ref, atol=3e-2, rtol=3e-2), (
        float(jnp.max(jnp.abs(out - ref))))

    # Nonzero-eps call exercises the self-term path numerically (same compiled kernel).
    eps2 = jnp.array([0.5], dtype=jnp.float32)
    out2 = jax.block_until_ready(gin_conv(adj, x, w, b, eps2))
    ref2_bf = jnp.dot(eps2[0] * x + jnp.dot(adj, x_bf, precision=hp), w.T, precision=hp) + b
    assert jnp.allclose(out2, ref2_bf, atol=1e-3, rtol=1e-3), (
        float(jnp.max(jnp.abs(out2 - ref2_bf))))

    print("KERNEL_OK")
</pallas_src>

<mosaic_0001>
module attributes {stable_mosaic.version = 11 : i64} {
  func.func @gin_conv_kernel(%arg0: i32, %arg1: i32, %arg2: memref<1xf32, #tpu.memory_space<smem>>, %arg3: memref<128x128xf32, #tpu.memory_space<vmem>>, %arg4: memref<256x64xf32, #tpu.memory_space<vmem>>, %arg5: memref<64x128xf32, #tpu.memory_space<vmem>>, %arg6: memref<1x128xf32, #tpu.memory_space<vmem>>, %arg7: memref<128x128xf32, #tpu.memory_space<vmem>>, %arg8: memref<128x64xf32, #tpu.memory_space<vmem>>) attributes {dimension_semantics = [#tpu.dimension_semantics<parallel>, #tpu.dimension_semantics<arbitrary>], iteration_bounds = array<i64: 2, 2>, scalar_prefetch = 0 : i64, scratch_operands = 1 : i64, tpu.core_type = #tpu.core_type<tc>, window_params = [{transform_indices = @transform_0, window_bounds = array<i64: 1>}, {transform_indices = @transform_1, window_bounds = array<i64: 128, 128>}, {pipeline_mode = #tpu.pipeline_mode<synchronous>, transform_indices = @transform_2, window_bounds = array<i64: 256, 64>}, {pipeline_mode = #tpu.pipeline_mode<synchronous>, transform_indices = @transform_3, window_bounds = array<i64: 64, 128>}, {pipeline_mode = #tpu.pipeline_mode<synchronous>, transform_indices = @transform_4, window_bounds = array<i64: 1, 128>}, {transform_indices = @transform_5, window_bounds = array<i64: 128, 128>}]} {
    %c0_i32 = arith.constant 0 : i32
    %0 = arith.cmpi eq, %arg1, %c0_i32 : i32
    %1 = arith.extui %0 : i1 to i32
    %c0_i32_0 = arith.constant 0 : i32
    %2 = arith.cmpi ne, %1, %c0_i32_0 : i32
    scf.if %2 {
      %cst_9 = arith.constant 0.000000e+00 : f32
      %20 = vector.broadcast %cst_9 : f32 to vector<128x64xf32>
      %c0_10 = arith.constant 0 : index
      %c0_11 = arith.constant 0 : index
      %21 = vector.load %arg8[%c0_10, %c0_11] : memref<128x64xf32, #tpu.memory_space<vmem>>, vector<128x64xf32>
      tpu.vector_store %arg8[%c0_10, %c0_11], %20 {strides = array<i32>} : memref<128x64xf32, #tpu.memory_space<vmem>>, vector<128x64xf32>,
    } else {
    }
    %c128_i32 = arith.constant 128 : i32
    %3 = arith.muli %arg1, %c128_i32 : i32
    %4 = tpu.assume_multiple %3, 128 : i32
    %5 = arith.index_cast %4 : i32 to index
    %c0 = arith.constant 0 : index
    %6 = vector.load %arg4[%5, %c0] : memref<256x64xf32, #tpu.memory_space<vmem>>, vector<128x64xf32>
    %c0_1 = arith.constant 0 : index
    %c0_2 = arith.constant 0 : index
    %7 = vector.load %arg8[%c0_1, %c0_2] : memref<128x64xf32, #tpu.memory_space<vmem>>, vector<128x64xf32>
    %c0_3 = arith.constant 0 : index
    %c0_4 = arith.constant 0 : index
    %8 = vector.load %arg3[%c0_3, %c0_4] : memref<128x128xf32, #tpu.memory_space<vmem>>, vector<128x128xf32>
    %9 = arith.truncf %8 : vector<128x128xf32> to vector<128x128xbf16>
    %10 = arith.truncf %6 : vector<128x64xf32> to vector<128x64xbf16>
    %cst = arith.constant dense<0.000000e+00> : vector<128x64xf32>
    %11 = tpu.matmul %9, %10, %cst {dimension_numbers = #tpu.dot_dimension_numbers<[1], [0], [0], [1], [0, 0, 1, 1], [], []>} : vector<128x128xbf16>, vector<128x64xbf16>, vector<128x64xf32> -> vector<128x64xf32>
    %12 = arith.addf %7, %11 : vector<128x64xf32>
    %c0_5 = arith.constant 0 : index
    %c0_6 = arith.constant 0 : index
    %13 = vector.load %arg8[%c0_5, %c0_6] : memref<128x64xf32, #tpu.memory_space<vmem>>, vector<128x64xf32>
    tpu.vector_store %arg8[%c0_5, %c0_6], %12 {strides = array<i32>} : memref<128x64xf32, #tpu.memory_space<vmem>>, vector<128x64xf32>,
    %14 = arith.cmpi eq, %arg1, %arg0 : i32
    %15 = arith.extui %14 : i1 to i32
    %c0_i32_7 = arith.constant 0 : i32
    %16 = arith.cmpi ne, %15, %c0_i32_7 : i32
    scf.if %16 {
      %c0_9 = arith.constant 0 : index
      %c0_10 = arith.constant 0 : index
      %20 = vector.load %arg8[%c0_9, %c0_10] : memref<128x64xf32, #tpu.memory_space<vmem>>, vector<128x64xf32>
      %c0_11 = arith.constant 0 : index
      %21 = memref.load %arg2[%c0_11] : memref<1xf32, #tpu.memory_space<smem>>
      %22 = vector.broadcast %21 : f32 to vector<128x64xf32>
      %23 = arith.mulf %22, %6 : vector<128x64xf32>
      %24 = arith.addf %20, %23 : vector<128x64xf32>
      %c0_12 = arith.constant 0 : index
      %c0_13 = arith.constant 0 : index
      %25 = vector.load %arg8[%c0_12, %c0_13] : memref<128x64xf32, #tpu.memory_space<vmem>>, vector<128x64xf32>
      tpu.vector_store %arg8[%c0_12, %c0_13], %24 {strides = array<i32>} : memref<128x64xf32, #tpu.memory_space<vmem>>, vector<128x64xf32>,
    } else {
    }
    %c1_i32 = arith.constant 1 : i32
    %17 = arith.cmpi eq, %arg1, %c1_i32 : i32
    %18 = arith.extui %17 : i1 to i32
    %c0_i32_8 = arith.constant 0 : i32
    %19 = arith.cmpi ne, %18, %c0_i32_8 : i32
    scf.if %19 {
      %c0_9 = arith.constant 0 : index
      %c0_10 = arith.constant 0 : index
      %20 = vector.load %arg8[%c0_9, %c0_10] : memref<128x64xf32, #tpu.memory_space<vmem>>, vector<128x64xf32>
      %c0_11 = arith.constant 0 : index
      %c0_12 = arith.constant 0 : index
      %21 = vector.load %arg5[%c0_11, %c0_12] : memref<64x128xf32, #tpu.memory_space<vmem>>, vector<64x128xf32>
      %cst_13 = arith.constant dense<0.000000e+00> : vector<128x128xf32>
      %22 = tpu.matmul %20, %21, %cst_13 {dimension_numbers = #tpu.dot_dimension_numbers<[1], [0], [0], [1], [0, 0, 1, 1], [], []>} : vector<128x64xf32>, vector<64x128xf32>, vector<128x128xf32> -> vector<128x128xf32>
      %c0_14 = arith.constant 0 : index
      %c0_15 = arith.constant 0 : index
      %23 = vector.load %arg6[%c0_14, %c0_15] : memref<1x128xf32, #tpu.memory_space<vmem>>, vector<1x128xf32>
      %24 = vector.broadcast %23 : vector<1x128xf32> to vector<128x128xf32>
      %25 = arith.addf %22, %24 : vector<128x128xf32>
      %c0_16 = arith.constant 0 : index
      %c0_17 = arith.constant 0 : index
      %26 = vector.load %arg7[%c0_16, %c0_17] : memref<128x128xf32, #tpu.memory_space<vmem>>, vector<128x128xf32>
      tpu.vector_store %arg7[%c0_16, %c0_17], %25 {strides = array<i32>} : memref<128x128xf32, #tpu.memory_space<vmem>>, vector<128x128xf32>,
    } else {
    }
    return
  }
  func.func @transform_0(%arg0: i32, %arg1: i32) -> i32 {
    %c0_i32 = arith.constant 0 : i32
    %c0_i32_0 = arith.constant 0 : i32
    return %c0_i32 : i32
  }
  func.func @transform_1(%arg0: i32, %arg1: i32) -> (i32, i32) {
    %c0_i32 = arith.constant 0 : i32
    return %arg0, %arg1 : i32, i32
  }
  func.func @transform_2(%arg0: i32, %arg1: i32) -> (i32, i32) {
    %c0_i32 = arith.constant 0 : i32
    %c0_i32_0 = arith.constant 0 : i32
    %c0_i32_1 = arith.constant 0 : i32
    return %c0_i32, %c0_i32_0 : i32, i32
  }
  func.func @transform_3(%arg0: i32, %arg1: i32) -> (i32, i32) {
    %c0_i32 = arith.constant 0 : i32
    %c0_i32_0 = arith.constant 0 : i32
    %c0_i32_1 = arith.constant 0 : i32
    return %c0_i32, %c0_i32_0 : i32, i32
  }
  func.func @transform_4(%arg0: i32, %arg1: i32) -> (i32, i32) {
    %c0_i32 = arith.constant 0 : i32
    %c0_i32_0 = arith.constant 0 : i32
    %c0_i32_1 = arith.constant 0 : i32
    return %c0_i32, %c0_i32_0 : i32, i32
  }
  func.func @transform_5(%arg0: i32, %arg1: i32) -> (i32, i32) {
    %c0_i32 = arith.constant 0 : i32
    %c0_i32_0 = arith.constant 0 : i32
    return %arg0, %c0_i32 : i32, i32
  }
}

</mosaic_0001>

<bundles_post_ra>
// kernel: gin_conv.1
= control target key start
LH: loop header
LB: loop body
LE: loop exit
PB: predicated region body
PF: predicated region fallthrough
CT: control target
= control target key end

     0   :  { %s1607_s0 = inlined_call_operand.<no memory space> [shape: f32[1], index: 0, kind: input, shape index: {}]   ;;  %s1608_s1 = inlined_call_operand.vmem [shape: f32[256,256], index: 1, kind: input, shape index: {}]   ;;  %s1609_s2 = inlined_call_operand.vmem [shape: f32[256,64], index: 2, kind: input, shape index: {}]   ;;  %s1610_s3 = inlined_call_operand.vmem [shape: f32[64,128], index: 3, kind: input, shape index: {}]   ;;  %s1611_s4 = inlined_call_operand.vmem [shape: f32[1,128], index: 4, kind: input, shape index: {}]   ;;  %s1612_s5 = inlined_call_operand.vmem [shape: f32[256,128], index: 5, kind: output, shape index: {}]  }
   0x1   :  { %10 = sst [smem:[#allocation3]] %s1607_s0 }
   0x2   :  { %s1284_s20 = smov 0   ;;  %s1286_s21 = smov 0  }
   0x3   :  { %s1288_s22 = smov 0   ;;  %s1290_s23 = smov 0  }
   0x4   :  { %s1292_s24 = smov 0   ;;  %s1294_s25 = smov 0  }
   0x5   :  { %s1296_s26 = smov 0  }
   0x6 LB: > { %s25_s0 = sadd.s32 1, %s1240_s24  ;;  %s28_s27 = sadd.s32 1, %s1244_s25  ;;  %s1248_s26 = sphi %s1296_s26, %s16_s26   ;;  %s1244_s25 = sphi %s1294_s25, %s1618_s25   ;;  %s1240_s24 = sphi %s1292_s24, %s1617_s24   ;;  %s1236_s23 = sphi %s1290_s23, %s1616_s23   ;;  %s1232_s22 = sphi %s1288_s22, %s1615_s22   ;;  %s1228_s21 = sphi %s1286_s21, %s1614_s21   ;;  %s1224_s20 = sphi %s1284_s20, %s1613_s20  }
   0x7   : > { %p26_p0 = scmp.ge.s32.totalorder %s25_s0, 2  ;;  %p65_p1 = scmp.ne.s32.totalorder %s1228_s21, %s1224_s20 }
   0x8   : > { %p66_p2 = scmp.eq.s32.totalorder %s1248_s26, 0  ;;  %s58_s6 = sadd.s32 1, %s1228_s21 }
   0x9   : > { %s1620_s0 = smov (%p26_p0, %s25_s0), 0  ;;  %s1622_s27 = smov (!%p26_p0, %s28_s27), %s1244_s25 }
   0xa   : > { %p67_p3 = por %p66_p2, %p65_p1  ;;  %p30_p4 = scmp.ge.s32.totalorder %s1622_s27, 2 }
   0xb   : > { %s54_s28 = ssub.s32 %s1240_s24, %s1620_s0  ;;  %p952_p6 = scmp.ge.s32.totalorder %s1248_s26, 4 }
   0xc   : > { %s1624_s27 = smov (%p30_p4, %s1622_s27), 0 }
   0xd   : > { %s53_s29 = ssub.s32 %s1244_s25, %s1624_s27  ;;  %192 = sbr.rel (%p952_p6) target bundleno = 34 (0x22), region = 32 }
   0xe   : > { %s55_s30 = sor.u32 %s54_s28, %s53_s29 }
   0xf   : > { %p56_p5 = scmp.eq.s32.totalorder %s55_s30, 0 }
  0x11   : > { %s1335_s7 = scalar_select %p56_p5, %s1228_s21, %s58_s6  }
  0x14   : > { %195 = sbr.rel (!%p67_p3) target bundleno = 34 (0x22), region = 36  ;;  %s197_s8 = sand.u32 (%p67_p3), 1, %s1228_s21  }
  0x15   : > { %s984_s9 = sshll.u32 (%p67_p3), %s1244_s25, 5  ;;  %s953_s10 = sshll.u32 (%p67_p3), %s197_s8, 7 }
  0x16   : > { %s202_s11 = sadd.s32 (%p67_p3), %s1240_s24, %s984_s9  ;;  %s199_s16 = scalar_lea.vmem (%p67_p3), [#allocation4], %s953_s10 }
  0x17   : > { %s956_s12 = sshll.u32 (%p67_p3), %s202_s11, 3 }
  0x18   : > { %s1344_s15 = scalar_lea.vmem (%p67_p3), %s1608_s1, %s956_s12 }
  0x19   : > { %v262_v0 = vld [vmem:[%s1344_s15] sm:$0xff] (%p67_p3)  ;;  %v264_v1 = vld [vmem:[%s1344_s15 + $0x10] sm:$0xff] (%p67_p3) }
  0x1a   : > { %v266_v2 = vld [vmem:[%s1344_s15 + $0x20] sm:$0xff] (%p67_p3)  ;;  %263 = vst [vmem:[%s199_s16] sm:$0xff] (%p67_p3), %v262_v0  ;;  %265 = vst [vmem:[%s199_s16 + $0x8] sm:$0xff] (%p67_p3), %v264_v1  ;;  %v268_v3 = vld [vmem:[%s1344_s15 + $0x30] sm:$0xff] (%p67_p3) }
  0x1b   : > { %267 = vst [vmem:[%s199_s16 + $0x10] sm:$0xff] %v266_v2  ;;  %v270_v4 = vld [vmem:[%s1344_s15 + $0x40] sm:$0xff]  ;;  %v272_v5 = vld [vmem:[%s1344_s15 + $0x50] sm:$0xff]  ;;  %269 = vst [vmem:[%s199_s16 + $0x18] sm:$0xff] %v268_v3 }
  0x1c   : > { %271 = vst [vmem:[%s199_s16 + $0x20] sm:$0xff] %v270_v4  ;;  %273 = vst [vmem:[%s199_s16 + $0x28] sm:$0xff] %v272_v5  ;;  %v274_v6 = vld [vmem:[%s1344_s15 + $0x60] sm:$0xff]  ;;  %v276_v7 = vld [vmem:[%s1344_s15 + $0x70] sm:$0xff] }
  0x1d   : > { %v278_v8 = vld [vmem:[%s1344_s15 + $0x80] sm:$0xff]  ;;  %275 = vst [vmem:[%s199_s16 + $0x30] sm:$0xff] %v274_v6  ;;  %277 = vst [vmem:[%s199_s16 + $0x38] sm:$0xff] %v276_v7  ;;  %v280_v9 = vld [vmem:[%s1344_s15 + $0x90] sm:$0xff] }
  0x1e   : > { %279 = vst [vmem:[%s199_s16 + $0x40] sm:$0xff] %v278_v8  ;;  %v282_v10 = vld [vmem:[%s1344_s15 + $0xa0] sm:$0xff]  ;;  %v284_v11 = vld [vmem:[%s1344_s15 + $0xb0] sm:$0xff]  ;;  %281 = vst [vmem:[%s199_s16 + $0x48] sm:$0xff] %v280_v9 }
  0x1f   : > { %283 = vst [vmem:[%s199_s16 + $0x50] sm:$0xff] %v282_v10  ;;  %285 = vst [vmem:[%s199_s16 + $0x58] sm:$0xff] %v284_v11  ;;  %v286_v12 = vld [vmem:[%s1344_s15 + $0xc0] sm:$0xff]  ;;  %v288_v13 = vld [vmem:[%s1344_s15 + $0xd0] sm:$0xff] }
  0x20   : > { %v290_v14 = vld [vmem:[%s1344_s15 + $0xe0] sm:$0xff]  ;;  %287 = vst [vmem:[%s199_s16 + $0x60] sm:$0xff] %v286_v12  ;;  %289 = vst [vmem:[%s199_s16 + $0x68] sm:$0xff] %v288_v13  ;;  %v292_v15 = vld [vmem:[%s1344_s15 + $0xf0] sm:$0xff] }
  0x21   : > { %291 = vst [vmem:[%s199_s16 + $0x70] sm:$0xff] %v290_v14  ;;  %293 = vst [vmem:[%s199_s16 + $0x78] sm:$0xff] %v292_v15 }
  0x22 PF: > { %p957_p7 = scmp.ge.s32.totalorder %s1248_s26, 1  ;;  %p298_p8 = scmp.lt.s32.totalorder %s1248_s26, 5 }
  0x24   : > { %p299_p9 = pnand %p957_p7, %p298_p8 }
  0x25   : > { %s305_s17 = sand.u32 (!%p299_p9), 1, %s1224_s20   ;;  %s959_s18 = sshll.u32 (!%p299_p9), %s1236_s23, 4 }
  0x26   : > { %302 = sbr.rel (%p299_p9) target bundleno = 577 (0x241), region = 74  ;;  %s958_s19 = sshll.u32 (!%p299_p9), %s305_s17, 7 }
  0x27   : > { %p334_p10 = scmp.lt.s32.totalorder (!%p299_p9), %s959_s18, 31  ;;  %s1371_s8 = scalar_lea.vmem (!%p299_p9), [#allocation4], %s958_s19 }
  0x28   : > { %p961_p11 = scmp.ne.s32.totalorder (!%p299_p9), %s1232_s22, 0 }
  0x2d   : > { %s1626_s18 = smov (!%p334_p10, %s959_s18), 31  ;;  %343 = sbr.rel (%p961_p11) target bundleno = 55 (0x37), region = 82 }
  0x2e   : > { %s960_s28 = sshll.u32 %s1626_s18, 3  ;;  %vm344_vm0 = vcmask (!%p961_p11), 523264   ;;  %v1250_v16 = vmov (!%p961_p11), 0.0  }
  0x2f   : > { %s1369_s6 = scalar_lea.vmem %s1612_s5, %s960_s28  ;;  %345 = vst.msk [vmem:[#allocation2] sm:$0xff] (!%p961_p11), %vm344_vm0, %v1250_v16  ;;  %346 = vst.msk [vmem:[#allocation2 + $0x8] sm:$0xff] (!%p961_p11), %vm344_vm0, %v1250_v16 }
  0x30   : > { %347 = vst.msk [vmem:[#allocation2 + $0x10] sm:$0xff] (!%p961_p11), %vm344_vm0, %v1250_v16  ;;  %348 = vst.msk [vmem:[#allocation2 + $0x18] sm:$0xff] (!%p961_p11), %vm344_vm0, %v1250_v16 }
  0x31   : > { %349 = vst.msk [vmem:[#allocation2 + $0x20] sm:$0xff] (!%p961_p11), %vm344_vm0, %v1250_v16  ;;  %350 = vst.msk [vmem:[#allocation2 + $0x28] sm:$0xff] (!%p961_p11), %vm344_vm0, %v1250_v16 }
  0x32   : > { %351 = vst.msk [vmem:[#allocation2 + $0x30] sm:$0xff] (!%p961_p11), %vm344_vm0, %v1250_v16  ;;  %352 = vst.msk [vmem:[#allocation2 + $0x38] sm:$0xff] (!%p961_p11), %vm344_vm0, %v1250_v16 }
  0x33   : > { %353 = vst.msk [vmem:[#allocation2 + $0x40] sm:$0xff] (!%p961_p11), %vm344_vm0, %v1250_v16  ;;  %354 = vst.msk [vmem:[#allocation2 + $0x48] sm:$0xff] (!%p961_p11), %vm344_vm0, %v1250_v16 }
  0x34   : > { %355 = vst.msk [vmem:[#allocation2 + $0x50] sm:$0xff] %vm344_vm0, %v1250_v16  ;;  %356 = vst.msk [vmem:[#allocation2 + $0x58] sm:$0xff] %vm344_vm0, %v1250_v16 }
  0x35   : > { %357 = vst.msk [vmem:[#allocation2 + $0x60] sm:$0xff] %vm344_vm0, %v1250_v16  ;;  %358 = vst.msk [vmem:[#allocation2 + $0x68] sm:$0xff] %vm344_vm0, %v1250_v16 }
  0x36   : > { %359 = vst.msk [vmem:[#allocation2 + $0x70] sm:$0xff] %vm344_vm0, %v1250_v16  ;;  %360 = vst.msk [vmem:[#allocation2 + $0x78] sm:$0xff] %vm344_vm0, %v1250_v16 }
  0x37 PF: > { %s962_s20 = sshll.u32 %s1232_s22, 7  ;;  %v395_v17 = vld [vmem:[%s1371_s8] sm:$0xff]  ;;  %v396_v18 = vld [vmem:[%s1371_s8 + $0x8] sm:$0xff]  ;;  %v397_v47 = vld [vmem:[%s1371_s8 + $0x10] sm:$0xff]  ;;  %vm540_vm1 = vcmask 523264   ;;  %p963_p12 = scmp.ne.s32.totalorder %s1232_s22, %s1236_s23 }
  0x38   : > { %v403_v19 = vld [vmem:[%s1371_s8 + $0x40] sm:$0xff]  ;;  %s1397_s11 = scalar_lea.vmem %s1609_s2, %s962_s20  ;;  %v411_v20 = vpack.c.bf16 %v396_v18, %v395_v17  ;;  %v404_v21 = vld [vmem:[%s1371_s8 + $0x48] sm:$0xff]  ;;  %v398_v48 = vld [vmem:[%s1371_s8 + $0x18] sm:$0xff]  ;;  %s577_s12 = sld [smem:[#allocation3]] (!%p963_p12) }
  0x39   : > { %v1401_v22 = vld [vmem:[%s1397_s11] sm:$0xff]  ;;  %v1404_v23 = vld [vmem:[%s1397_s11 + $0x8] sm:$0xff]  ;;  %v1407_v24 = vld [vmem:[%s1397_s11 + $0x10] sm:$0xff]  ;;  %v415_v25 = vpack.c.bf16 %v404_v21, %v403_v19  ;;  %v412_v55 = vpack.c.bf16 %v398_v48, %v397_v47 }
  0x3a   : > { %v419_v26 = vpack.c.bf16 %v1404_v23, %v1401_v22  ;;  %v1412_v27 = vld [vmem:[%s1397_s11 + $0x18] sm:$0xff]  ;;  %1041 = vmatprep.mubr.bf16.mxu0 %v411_v20  ;;  %v1417_v29 = vld [vmem:[%s1397_s11 + $0x20] sm:$0xff]  ;;  %v1420_v30 = vld [vmem:[%s1397_s11 + $0x28] sm:$0xff] }
  0x3b   : > { %v420_v28 = vpack.c.bf16 %v1412_v27, %v1407_v24  ;;  %1049 = vmatprep.mubr.bf16.mxu1 %v415_v25  ;;  %v421_v31 = vpack.c.bf16 %v1420_v30, %v1417_v29  ;;  %v1425_v32 = vld [vmem:[%s1397_s11 + $0x30] sm:$0xff]  ;;  %v1428_v33 = vld [vmem:[%s1397_s11 + $0x38] sm:$0xff]  ;;  %v1433_v35 = vld [vmem:[%s1397_s11 + $0x40] sm:$0xff] }
  0x3c   : > { %1025 = vmatprep.subr.bf16.mxu0 %v419_v26  ;;  %1113 = vmatprep.subr.bf16.mxu1 %v419_v26  ;;  %v422_v34 = vpack.c.bf16 %v1428_v33, %v1425_v32  ;;  %v1436_v36 = vld [vmem:[%s1397_s11 + $0x48] sm:$0xff]  ;;  %v1441_v38 = vld [vmem:[%s1397_s11 + $0x50] sm:$0xff]  ;;  %v1444_v39 = vld [vmem:[%s1397_s11 + $0x58] sm:$0xff] }
  0x3d   : > { %1026 = vmatpush3.bf16.msra.mxu0 %v419_v26  ;;  %1121 = vmatpush3.bf16.msra.mxu1 %v419_v26  ;;  %v423_v37 = vpack.c.bf16 %v1436_v36, %v1433_v35  ;;  %v424_v40 = vpack.c.bf16 %v1444_v39, %v1441_v38  ;;  %v1449_v41 = vld [vmem:[%s1397_s11 + $0x60] sm:$0xff]  ;;  %v1452_v42 = vld [vmem:[%s1397_s11 + $0x68] sm:$0xff]  ;;  %v1457_v44 = vld [vmem:[%s1397_s11 + $0x70] sm:$0xff] }
  0x3e   : > { %1027 = vmatprep.subr.bf16.mxu0 %v420_v28  ;;  %1114 = vmatprep.subr.bf16.mxu1 %v420_v28  ;;  %v425_v43 = vpack.c.bf16 %v1452_v42, %v1449_v41  ;;  %v1460_v45 = vld [vmem:[%s1397_s11 + $0x78] sm:$0xff]  ;;  %v405_v49 = vld [vmem:[%s1371_s8 + $0x50] sm:$0xff]  ;;  %v399_v51 = vld [vmem:[%s1371_s8 + $0x20] sm:$0xff] }
  0x3f   : > { %v426_v46 = vpack.c.bf16 %v1460_v45, %v1457_v44  ;;  %v406_v50 = vld [vmem:[%s1371_s8 + $0x58] sm:$0xff]  ;;  %v400_v52 = vld [vmem:[%s1371_s8 + $0x28] sm:$0xff]  ;;  %v407_v53 = vld [vmem:[%s1371_s8 + $0x60] sm:$0xff] }
  0x40   : > { %v408_v54 = vld [vmem:[%s1371_s8 + $0x68] sm:$0xff]  ;;  %v416_v56 = vpack.c.bf16 %v406_v50, %v405_v49  ;;  %v413_v57 = vpack.c.bf16 %v400_v52, %v399_v51  ;;  %v401_v59 = vld [vmem:[%s1371_s8 + $0x30] sm:$0xff]  ;;  %v402_v60 = vld [vmem:[%s1371_s8 + $0x38] sm:$0xff] }
  0x41   : > { %1028 = vmatpush3.bf16.msra.mxu0 %v420_v28  ;;  %1122 = vmatpush3.bf16.msra.mxu1 %v420_v28  ;;  %v417_v58 = vpack.c.bf16 %v408_v54, %v407_v53  ;;  %v409_v61 = vld [vmem:[%s1371_s8 + $0x70] sm:$0xff]  ;;  %v410_v62 = vld [vmem:[%s1371_s8 + $0x78] sm:$0xff]  ;;  %v414_v63 = vpack.c.bf16 %v402_v60, %v401_v59  ;;  %v379_v3 = vld [vmem:[#allocation2] sm:$0xff] }
  0x42   : > { %1029 = vmatprep.subr.bf16.mxu0 %v421_v31  ;;  %1115 = vmatprep.subr.bf16.mxu1 %v421_v31  ;;  %v418_v0 = vpack.c.bf16 %v410_v62, %v409_v61  ;;  %v381_v1 = vld [vmem:[#allocation2 + $0x10] sm:$0xff]  ;;  %v387_v4 = vld [vmem:[#allocation2 + $0x40] sm:$0xff]  ;;  %v382_v7 = vld [vmem:[#allocation2 + $0x18] sm:$0xff] }
  0x43   : > { %v389_v2 = vld [vmem:[#allocation2 + $0x50] sm:$0xff]  ;;  %v390_v8 = vld [vmem:[#allocation2 + $0x58] sm:$0xff]  ;;  %v380_v13 = vld [vmem:[#allocation2 + $0x8] sm:$0xff] }
  0x44   : > { %v388_v14 = vld [vmem:[#allocation2 + $0x48] sm:$0xff]  ;;  %v386_v47 = vld [vmem:[#allocation2 + $0x38] sm:$0xff] }
  0x45   : > { %1030 = vmatpush3.bf16.msra.mxu0 %v421_v31  ;;  %1123 = vmatpush3.bf16.msra.mxu1 %v421_v31  ;;  %v385_v31 = vld [vmem:[#allocation2 + $0x30] sm:$0xff]  ;;  %v394_v48 = vld [vmem:[#allocation2 + $0x78] sm:$0xff]  ;;  %v384_v53 = vld [vmem:[#allocation2 + $0x28] sm:$0xff] }
  0x46   : > { %1031 = vmatprep.subr.bf16.mxu0 %v422_v34  ;;  %1116 = vmatprep.subr.bf16.mxu1 %v422_v34  ;;  %v392_v54 = vld [vmem:[#allocation2 + $0x68] sm:$0xff] }
  0x49   : > { %1032 = vmatpush3.bf16.msra.mxu0 %v422_v34  ;;  %1124 = vmatpush3.bf16.msra.mxu1 %v422_v34  ;;  %v393_v34 = vld [vmem:[#allocation2 + $0x70] sm:$0xff] }
  0x4a   : > { %1033 = vmatprep.subr.bf16.mxu0 %v423_v37  ;;  %1117 = vmatprep.subr.bf16.mxu1 %v423_v37 }
  0x4d   : > { %1034 = vmatpush3.bf16.msra.mxu0 %v423_v37  ;;  %1125 = vmatpush3.bf16.msra.mxu1 %v423_v37  ;;  %v383_v37 = vld [vmem:[#allocation2 + $0x20] sm:$0xff] }
  0x4e   : > { %1035 = vmatprep.subr.bf16.mxu0 %v424_v40  ;;  %1118 = vmatprep.subr.bf16.mxu1 %v424_v40 }
  0x51   : > { %1036 = vmatpush3.bf16.msra.mxu0 %v424_v40  ;;  %1126 = vmatpush3.bf16.msra.mxu1 %v424_v40  ;;  %v391_v40 = vld [vmem:[#allocation2 + $0x60] sm:$0xff] }
  0x52   : > { %1037 = vmatprep.subr.bf16.mxu0 %v425_v43  ;;  %1119 = vmatprep.subr.bf16.mxu1 %v425_v43 }
  0x55   : > { %1038 = vmatpush3.bf16.msra.mxu0 %v425_v43  ;;  %1127 = vmatpush3.bf16.msra.mxu1 %v425_v43 }
  0x56   : > { %1039 = vmatprep.subr.bf16.mxu0 %v426_v46  ;;  %1120 = vmatprep.subr.bf16.mxu1 %v426_v46 }
  0x59   : > { %1040 = vmatpush3.bf16.msra.mxu0 %v426_v46  ;;  %1128 = vmatpush3.bf16.msra.mxu1 %v426_v46 }
  0x5c   : > { %1042 = vmatmul.mubr.bf16.vlgmr.msra.gmra.mrb[0].mxu0 %v412_v55  ;;  %1050 = vmatmul.mubr.bf16.vlgmr.msra.gmra.mrb[0].mxu1 %v416_v56 }
  0x5d   : > { %1045 = vmatprep.mubr.bf16.mxu0 %v413_v57  ;;  %1053 = vmatprep.mubr.bf16.mxu1 %v417_v58 }
  0x64   : > { %1046 = vmatmul.mubr.bf16.gmra.mrb[4].mxu0 %v414_v63  ;;  %1054 = vmatmul.mubr.bf16.gmra.mrb[4].mxu1 %v418_v0 }
 0x12f   : > { %v1043_v5 = vpop.f32.mrb[0].mxu0  ;;  %v1051_v6 = vpop.f32.mrb[0].mxu1 }
 0x130   : > { %v526_v9 = vadd.f32 %v1043_v5, %v381_v1  ;;  %v534_v10 = vadd.f32 %v1051_v6, %v389_v2  ;;  %v461_v11 = vpop.f32.mrb[1].mxu0  ;;  %v493_v12 = vpop.f32.mrb[1].mxu1 }
 0x131   : > { %v524_v15 = vadd.f32 %v461_v11, %v379_v3  ;;  %v532_v16 = vadd.f32 %v493_v12, %v387_v4  ;;  %v1044_v17 = vpop.f32.mrb[2].mxu0  ;;  %v1052_v18 = vpop.f32.mrb[2].mxu1  ;;  %v578_v3 = vstv (!%p963_p12), %s577_s12 }
 0x132   : > { %543 = vst.msk [vmem:[#allocation2 + $0x10] sm:$0xff] %vm540_vm1, %v526_v9  ;;  %551 = vst.msk [vmem:[#allocation2 + $0x50] sm:$0xff] %vm540_vm1, %v534_v10  ;;  %v527_v19 = vadd.f32 %v1044_v17, %v382_v7  ;;  %v535_v20 = vadd.f32 %v1052_v18, %v390_v8  ;;  %v464_v21 = vpop.f32.mrb[3].mxu0  ;;  %v496_v25 = vpop.f32.mrb[3].mxu1  ;;  %v579_v7 = vmul.f32 (!%p963_p12), %v578_v3, %v1401_v22 }
 0x133   : > { %541 = vst.msk [vmem:[#allocation2] sm:$0xff] %vm540_vm1, %v524_v15  ;;  %549 = vst.msk [vmem:[#allocation2 + $0x40] sm:$0xff] %vm540_vm1, %v532_v16  ;;  %v525_v26 = vadd.f32 %v464_v21, %v380_v13  ;;  %v533_v28 = vadd.f32 %v496_v25, %v388_v14  ;;  %v580_v8 = vmul.f32 (!%p963_p12), %v578_v3, %v1404_v23 }
 0x134   : > { %544 = vst.msk [vmem:[#allocation2 + $0x18] sm:$0xff] %vm540_vm1, %v527_v19  ;;  %552 = vst.msk [vmem:[#allocation2 + $0x58] sm:$0xff] %vm540_vm1, %v535_v20  ;;  %v581_v9 = vmul.f32 (!%p963_p12), %v578_v3, %v1407_v24  ;;  %v582_v10 = vmul.f32 (!%p963_p12), %v578_v3, %v1412_v27  ;;  %v583_v14 = vmul.f32 (!%p963_p12), %v578_v3, %v1417_v29 }
 0x135   : > { %542 = vst.msk [vmem:[#allocation2 + $0x8] sm:$0xff] %vm540_vm1, %v525_v26  ;;  %550 = vst.msk [vmem:[#allocation2 + $0x48] sm:$0xff] %vm540_vm1, %v533_v28  ;;  %v584_v15 = vmul.f32 (!%p963_p12), %v578_v3, %v1420_v30  ;;  %v585_v16 = vmul.f32 (!%p963_p12), %v578_v3, %v1425_v32  ;;  %v586_v17 = vmul.f32 (!%p963_p12), %v578_v3, %v1428_v33 }
 0x136   : > { %v587_v29 = vmul.f32 (!%p963_p12), %v578_v3, %v1433_v35  ;;  %v588_v30 = vmul.f32 (!%p963_p12), %v578_v3, %v1436_v36  ;;  %v589_v32 = vmul.f32 (!%p963_p12), %v578_v3, %v1441_v38  ;;  %v590_v33 = vmul.f32 (!%p963_p12), %v578_v3, %v1444_v39 }
 0x137   : > { %v1047_v43 = vpop.f32.mrb[4].mxu0  ;;  %v1055_v46 = vpop.f32.mrb[4].mxu1  ;;  %560 = sbr.rel (%p963_p12) target bundleno = 329 (0x149), region = 86  ;;  %v592_v35 = vmul.f32 (!%p963_p12), %v578_v3, %v1452_v42  ;;  %v593_v36 = vmul.f32 (!%p963_p12), %v578_v3, %v1457_v44  ;;  %v594_v38 = vmul.f32 (!%p963_p12), %v578_v3, %v1460_v45 }
 0x138   : > { %v530_v49 = vadd.f32 %v1047_v43, %v385_v31  ;;  %v538_v50 = vadd.f32 %v1055_v46, %v393_v34  ;;  %v477_v51 = vpop.f32.mrb[5].mxu0  ;;  %v509_v52 = vpop.f32.mrb[5].mxu1  ;;  %v591_v46 = vmul.f32 (!%p963_p12), %v578_v3, %v1449_v41 }
 0x139   : > { %v528_v55 = vadd.f32 %v477_v51, %v383_v37  ;;  %v536_v56 = vadd.f32 %v509_v52, %v391_v40  ;;  %v1048_v57 = vpop.f32.mrb[6].mxu0  ;;  %v1056_v58 = vpop.f32.mrb[6].mxu1  ;;  %v563_v4 = vld [vmem:[#allocation2 + $0x10] sm:$0xff] (!%p963_p12) }
 0x13a   : > { %547 = vst.msk [vmem:[#allocation2 + $0x30] sm:$0xff] %vm540_vm1, %v530_v49  ;;  %555 = vst.msk [vmem:[#allocation2 + $0x70] sm:$0xff] %vm540_vm1, %v538_v50  ;;  %v531_v59 = vadd.f32 %v1048_v57, %v386_v47  ;;  %v539_v60 = vadd.f32 %v1056_v58, %v394_v48  ;;  %v480_v61 = vpop.f32.mrb[7].mxu0  ;;  %v512_v62 = vpop.f32.mrb[7].mxu1  ;;  %v561_v1 = vld [vmem:[#allocation2] sm:$0xff] (!%p963_p12)  ;;  %v597_v22 = vadd.f32 (!%p963_p12), %v581_v9, %v563_v4  ;;  %v571_v28 = vld [vmem:[#allocation2 + $0x50] sm:$0xff] (!%p963_p12) }
 0x13b   : > { %545 = vst.msk [vmem:[#allocation2 + $0x20] sm:$0xff] %vm540_vm1, %v528_v55  ;;  %553 = vst.msk [vmem:[#allocation2 + $0x60] sm:$0xff] %vm540_vm1, %v536_v56  ;;  %v529_v63 = vadd.f32 %v480_v61, %v384_v53  ;;  %v537_v0 = vadd.f32 %v512_v62, %v392_v54  ;;  %v564_v5 = vld [vmem:[#allocation2 + $0x18] sm:$0xff] (!%p963_p12)  ;;  %v595_v18 = vadd.f32 (!%p963_p12), %v579_v7, %v561_v1  ;;  %v569_v23 = vld [vmem:[#allocation2 + $0x40] sm:$0xff] (!%p963_p12) }
 0x13c   : > { %548 = vst.msk [vmem:[#allocation2 + $0x38] sm:$0xff] %vm540_vm1, %v531_v59  ;;  %556 = vst.msk [vmem:[#allocation2 + $0x78] sm:$0xff] %vm540_vm1, %v539_v60  ;;  %v562_v2 = vld [vmem:[#allocation2 + $0x8] sm:$0xff] (!%p963_p12)  ;;  %v598_v20 = vadd.f32 (!%p963_p12), %v582_v10, %v564_v5  ;;  %v572_v31 = vld [vmem:[#allocation2 + $0x58] sm:$0xff] (!%p963_p12)  ;;  %v603_v39 = vadd.f32 (!%p963_p12), %v587_v29, %v569_v23  ;;  %v605_v48 = vadd.f32 (!%p963_p12), %v589_v32, %v571_v28 }
 0x13d   : > { %546 = vst.msk [vmem:[#allocation2 + $0x28] sm:$0xff] %vm540_vm1, %v529_v63  ;;  %554 = vst.msk [vmem:[#allocation2 + $0x68] sm:$0xff] %vm540_vm1, %v537_v0  ;;  %v596_v19 = vadd.f32 (!%p963_p12), %v580_v8, %v562_v2  ;;  %v570_v21 = vld [vmem:[#allocation2 + $0x48] sm:$0xff] (!%p963_p12)  ;;  %v606_v49 = vadd.f32 (!%p963_p12), %v590_v33, %v572_v31 }
 0x13e   : > { %611 = vst.msk [vmem:[#allocation2] sm:$0xff] %vm540_vm1, %v595_v18  ;;  %613 = vst.msk [vmem:[#allocation2 + $0x10] sm:$0xff] %vm540_vm1, %v597_v22  ;;  %v604_v47 = vadd.f32 %v588_v30, %v570_v21 }
 0x13f   : > { %612 = vst.msk [vmem:[#allocation2 + $0x8] sm:$0xff] %vm540_vm1, %v596_v19  ;;  %614 = vst.msk [vmem:[#allocation2 + $0x18] sm:$0xff] %vm540_vm1, %v598_v20 }
 0x140   : > { %619 = vst.msk [vmem:[#allocation2 + $0x40] sm:$0xff] %vm540_vm1, %v603_v39  ;;  %620 = vst.msk [vmem:[#allocation2 + $0x48] sm:$0xff] %vm540_vm1, %v604_v47 }
 0x141   : > { %v567_v12 = vld [vmem:[#allocation2 + $0x30] sm:$0xff]  ;;  %621 = vst.msk [vmem:[#allocation2 + $0x50] sm:$0xff] %vm540_vm1, %v605_v48  ;;  %622 = vst.msk [vmem:[#allocation2 + $0x58] sm:$0xff] %vm540_vm1, %v606_v49 }
 0x142   : > { %v565_v6 = vld [vmem:[#allocation2 + $0x20] sm:$0xff]  ;;  %v601_v27 = vadd.f32 %v585_v16, %v567_v12  ;;  %v575_v40 = vld [vmem:[#allocation2 + $0x70] sm:$0xff] }
 0x143   : > { %v568_v13 = vld [vmem:[#allocation2 + $0x38] sm:$0xff]  ;;  %v599_v24 = vadd.f32 %v583_v14, %v565_v6  ;;  %v573_v34 = vld [vmem:[#allocation2 + $0x60] sm:$0xff]  ;;  %v609_v52 = vadd.f32 %v593_v36, %v575_v40 }
 0x144   : > { %v566_v11 = vld [vmem:[#allocation2 + $0x28] sm:$0xff]  ;;  %v602_v26 = vadd.f32 %v586_v17, %v568_v13  ;;  %v576_v43 = vld [vmem:[#allocation2 + $0x78] sm:$0xff]  ;;  %617 = vst.msk [vmem:[#allocation2 + $0x30] sm:$0xff] %vm540_vm1, %v601_v27  ;;  %v607_v50 = vadd.f32 %v591_v46, %v573_v34 }
 0x145   : > { %v600_v25 = vadd.f32 %v584_v15, %v566_v11  ;;  %v574_v37 = vld [vmem:[#allocation2 + $0x68] sm:$0xff]  ;;  %615 = vst.msk [vmem:[#allocation2 + $0x20] sm:$0xff] %vm540_vm1, %v599_v24  ;;  %v610_v53 = vadd.f32 %v594_v38, %v576_v43  ;;  %625 = vst.msk [vmem:[#allocation2 + $0x70] sm:$0xff] %vm540_vm1, %v609_v52 }
 0x146   : > { %618 = vst.msk [vmem:[#allocation2 + $0x38] sm:$0xff] %vm540_vm1, %v602_v26  ;;  %v608_v51 = vadd.f32 %v592_v35, %v574_v37  ;;  %623 = vst.msk [vmem:[#allocation2 + $0x60] sm:$0xff] %vm540_vm1, %v607_v50 }
 0x147   : > { %616 = vst.msk [vmem:[#allocation2 + $0x28] sm:$0xff] %vm540_vm1, %v600_v25  ;;  %626 = vst.msk [vmem:[#allocation2 + $0x78] sm:$0xff] %vm540_vm1, %v610_v53 }
 0x148   : > { %624 = vst.msk [vmem:[#allocation2 + $0x68] sm:$0xff] %vm540_vm1, %v608_v51 }
 0x149 PF: > { %p964_p13 = scmp.ne.s32.totalorder %s1232_s22, 1 }
 0x14a   : > { %v647_v41 = vld [vmem:[%s1610_s3] sm:$0xff] (!%p964_p13)  ;;  %v648_v42 = vld [vmem:[%s1610_s3 + $0x8] sm:$0xff] (!%p964_p13)  ;;  %v649_v44 = vld [vmem:[%s1610_s3 + $0x10] sm:$0xff] (!%p964_p13) }
 0x14b   : > { %630 = sbr.rel (%p964_p13) target bundleno = 577 (0x241), region = 90  ;;  %v1097_v45 = vpack.c.bf16 (!%p964_p13), %v648_v42, %v647_v41  ;;  %v650_v54 = vld [vmem:[%s1610_s3 + $0x18] sm:$0xff] (!%p964_p13)  ;;  %v651_v56 = vld [vmem:[%s1610_s3 + $0x20] sm:$0xff] (!%p964_p13)  ;;  %v652_v57 = vld [vmem:[%s1610_s3 + $0x28] sm:$0xff] (!%p964_p13) }
 0x14c   : > { %v1101_v55 = vpack.c.bf16 (!%p964_p13), %v650_v54, %v649_v44  ;;  %v639_v59 = vld [vmem:[#allocation2 + $0x40] sm:$0xff] (!%p964_p13)  ;;  %v1105_v60 = vpack.c.bf16 (!%p964_p13), %v652_v57, %v651_v56  ;;  %v653_v61 = vld [vmem:[%s1610_s3 + $0x30] sm:$0xff] (!%p964_p13)  ;;  %v654_v62 = vld [vmem:[%s1610_s3 + $0x38] sm:$0xff] (!%p964_p13) }
 0x14d   : > { %1098 = vmatprep.subr.bf16.mxu0 (!%p964_p13), %v1097_v45  ;;  %1129 = vmatprep.subr.bf16.mxu1 (!%p964_p13), %v1097_v45  ;;  %v1109_v63 = vpack.c.bf16 (!%p964_p13), %v654_v62, %v653_v61  ;;  %v632_v0 = vld [vmem:[#allocation2 + $0x8] sm:$0xff] (!%p964_p13)  ;;  %v641_v3 = vld [vmem:[#allocation2 + $0x50] sm:$0xff] (!%p964_p13)  ;;  %v634_v4 = vld [vmem:[#allocation2 + $0x18] sm:$0xff] (!%p964_p13) }
 0x14e   : > { %1100 = vmatpush3.bf16.msra.mxu0 (!%p964_p13), %v1097_v45  ;;  %1133 = vmatpush3.bf16.msra.mxu1 (!%p964_p13), %v1097_v45  ;;  %v640_v1 = vld [vmem:[#allocation2 + $0x48] sm:$0xff] (!%p964_p13)  ;;  %v642_v5 = vld [vmem:[#allocation2 + $0x58] sm:$0xff] (!%p964_p13)  ;;  %v635_v6 = vld [vmem:[#allocation2 + $0x20] sm:$0xff] (!%p964_p13) }
 0x14f   : > { %1102 = vmatprep.subr.bf16.mxu0 (!%p964_p13), %v1101_v55  ;;  %1130 = vmatprep.subr.bf16.mxu1 (!%p964_p13), %v1101_v55  ;;  %v643_v7 = vld [vmem:[#allocation2 + $0x60] sm:$0xff] (!%p964_p13)  ;;  %v636_v8 = vld [vmem:[#allocation2 + $0x28] sm:$0xff] (!%p964_p13)  ;;  %v637_v10 = vld [vmem:[#allocation2 + $0x30] sm:$0xff] (!%p964_p13) }
 0x150   : > { %v631_v58 = vld [vmem:[#allocation2] sm:$0xff] (!%p964_p13)  ;;  %1085 = vmatprep.mubr.msk.f32.mxu1 (!%p964_p13), %vm540_vm1, %v639_v59  ;;  %v633_v2 = vld [vmem:[#allocation2 + $0x10] sm:$0xff] (!%p964_p13)  ;;  %v644_v9 = vld [vmem:[#allocation2 + $0x68] sm:$0xff] (!%p964_p13) }
 0x151   : > { %1073 = vmatprep.mubr.msk.f32.mxu0 (!%p964_p13), %vm540_vm1, %v631_v58  ;;  %v645_v11 = vld [vmem:[#allocation2 + $0x70] sm:$0xff] (!%p964_p13)  ;;  %v638_v12 = vld [vmem:[#allocation2 + $0x38] sm:$0xff] (!%p964_p13)  ;;  %v965_v14 = vld [vmem:[%s1611_s4] ss:$0 sm:$0xff] (!%p964_p13) }
 0x152   : > { %1104 = vmatpush3.bf16.msra.mxu0 %v1101_v55  ;;  %1134 = vmatpush3.bf16.msra.mxu1 %v1101_v55  ;;  %v646_v13 = vld [vmem:[#allocation2 + $0x78] sm:$0xff] }
 0x153   : > { %1106 = vmatprep.subr.bf16.mxu0 %v1105_v60  ;;  %1131 = vmatprep.subr.bf16.mxu1 %v1105_v60 }
 0x156   : > { %1108 = vmatpush3.bf16.msra.mxu0 %v1105_v60  ;;  %1135 = vmatpush3.bf16.msra.mxu1 %v1105_v60 }
 0x157   : > { %1110 = vmatprep.subr.bf16.mxu0 %v1109_v63  ;;  %1132 = vmatprep.subr.bf16.mxu1 %v1109_v63 }
 0x15a   : > { %1112 = vmatpush3.bf16.msra.mxu0 %v1109_v63  ;;  %1136 = vmatpush3.bf16.msra.mxu1 %v1109_v63 }
 0x15d   : > { %1074 = vmatmul.mubr.msk.f32.vlgmr.msra.gmra.mrb[0].mxu0 %vm540_vm1, %v632_v0  ;;  %1086 = vmatmul.mubr.msk.f32.vlgmr.msra.gmra.mrb[0].mxu1 %vm540_vm1, %v640_v1 }
 0x15e   : > { %1076 = vmatprep.mubr.msk.f32.mxu0 %vm540_vm1, %v633_v2  ;;  %1088 = vmatprep.mubr.msk.f32.mxu1 %vm540_vm1, %v641_v3 }
 0x161   : > { %1077 = vmatmul.mubr.msk.f32.gmra.mrb[2].mxu0 %vm540_vm1, %v634_v4  ;;  %1089 = vmatmul.mubr.msk.f32.gmra.mrb[2].mxu1 %vm540_vm1, %v642_v5 }
 0x162   : > { %1079 = vmatprep.mubr.msk.f32.mxu0 %vm540_vm1, %v635_v6  ;;  %1091 = vmatprep.mubr.msk.f32.mxu1 %vm540_vm1, %v643_v7 }
 0x165   : > { %1080 = vmatmul.mubr.msk.f32.gmra.mrb[4].mxu0 %vm540_vm1, %v636_v8  ;;  %1092 = vmatmul.mubr.msk.f32.gmra.mrb[4].mxu1 %vm540_vm1, %v644_v9 }
 0x166   : > { %1082 = vmatprep.mubr.msk.f32.mxu0 %vm540_vm1, %v637_v10  ;;  %1094 = vmatprep.mubr.msk.f32.mxu1 %vm540_vm1, %v645_v11 }
 0x169   : > { %1083 = vmatmul.mubr.msk.f32.gmra.mrb[6].mxu0 %vm540_vm1, %v638_v12  ;;  %1095 = vmatmul.mubr.msk.f32.gmra.mrb[6].mxu1 %vm540_vm1, %v646_v13 }
 0x230   : > { %v1075_v15 = vpop.f32.mrb[0].mxu0  ;;  %v1087_v16 = vpop.f32.mrb[0].mxu1 }
 0x231   : > { %v782_v17 = vadd.f32 %v1075_v15, %v965_v14  ;;  %v822_v18 = vadd.f32 %v1087_v16, %v965_v14  ;;  %v776_v19 = vpop.f32.mrb[1].mxu0  ;;  %v816_v22 = vpop.f32.mrb[1].mxu1 }
 0x232   : > { %v777_v20 = vadd.f32 %v965_v14, %v776_v19  ;;  %v817_v23 = vadd.f32 %v965_v14, %v816_v22 }
 0x233   : > { %856 = vst [vmem:[%s1369_s6 + $0x8] sm:$0xff] %v782_v17  ;;  %864 = vst [vmem:[%s1369_s6 + $0x48] sm:$0xff] %v822_v18 }
 0x234   : > { %855 = vst [vmem:[%s1369_s6] sm:$0xff] %v777_v20  ;;  %863 = vst [vmem:[%s1369_s6 + $0x40] sm:$0xff] %v817_v23  ;;  %v1078_v21 = vpop.f32.mrb[2].mxu0  ;;  %v1090_v24 = vpop.f32.mrb[2].mxu1 }
 0x235   : > { %v792_v25 = vadd.f32 %v1078_v21, %v965_v14  ;;  %v832_v27 = vadd.f32 %v1090_v24, %v965_v14  ;;  %v786_v26 = vpop.f32.mrb[3].mxu0  ;;  %v826_v28 = vpop.f32.mrb[3].mxu1 }
 0x236   : > { %v787_v31 = vadd.f32 %v965_v14, %v786_v26  ;;  %v827_v34 = vadd.f32 %v965_v14, %v826_v28 }
 0x237   : > { %858 = vst [vmem:[%s1369_s6 + $0x18] sm:$0xff] %v792_v25  ;;  %866 = vst [vmem:[%s1369_s6 + $0x58] sm:$0xff] %v832_v27 }
 0x238   : > { %857 = vst [vmem:[%s1369_s6 + $0x10] sm:$0xff] %v787_v31  ;;  %865 = vst [vmem:[%s1369_s6 + $0x50] sm:$0xff] %v827_v34  ;;  %v1081_v29 = vpop.f32.mrb[4].mxu0  ;;  %v1093_v30 = vpop.f32.mrb[4].mxu1 }
 0x239   : > { %v802_v32 = vadd.f32 %v1081_v29, %v965_v14  ;;  %v842_v33 = vadd.f32 %v1093_v30, %v965_v14  ;;  %v796_v37 = vpop.f32.mrb[5].mxu0  ;;  %v836_v40 = vpop.f32.mrb[5].mxu1 }
 0x23a   : > { %v797_v43 = vadd.f32 %v965_v14, %v796_v37  ;;  %v837_v46 = vadd.f32 %v965_v14, %v836_v40 }
 0x23b   : > { %860 = vst [vmem:[%s1369_s6 + $0x28] sm:$0xff] %v802_v32  ;;  %868 = vst [vmem:[%s1369_s6 + $0x68] sm:$0xff] %v842_v33 }
 0x23c   : > { %859 = vst [vmem:[%s1369_s6 + $0x20] sm:$0xff] %v797_v43  ;;  %867 = vst [vmem:[%s1369_s6 + $0x60] sm:$0xff] %v837_v46  ;;  %v1084_v35 = vpop.f32.mrb[6].mxu0  ;;  %v1096_v36 = vpop.f32.mrb[6].mxu1 }
 0x23d   : > { %v812_v38 = vadd.f32 %v1084_v35, %v965_v14  ;;  %v852_v39 = vadd.f32 %v1096_v36, %v965_v14  ;;  %v806_v47 = vpop.f32.mrb[7].mxu0  ;;  %v846_v48 = vpop.f32.mrb[7].mxu1 }
 0x23e   : > { %v807_v49 = vadd.f32 %v965_v14, %v806_v47  ;;  %v847_v50 = vadd.f32 %v965_v14, %v846_v48 }
 0x23f   : > { %862 = vst [vmem:[%s1369_s6 + $0x38] sm:$0xff] %v812_v38  ;;  %870 = vst [vmem:[%s1369_s6 + $0x78] sm:$0xff] %v852_v39 }
 0x240   : > { %861 = vst [vmem:[%s1369_s6 + $0x30] sm:$0xff] %v807_v49  ;;  %869 = vst [vmem:[%s1369_s6 + $0x70] sm:$0xff] %v847_v50 }
 0x241 PF: > { %s16_s26 = sadd.s32 1, %s1248_s26   ;;  %s1613_s20 = smov %s1228_s21 }
 0x242   : > { %p13_p0 = scmp.ge.s32.totalorder %s16_s26, 6   ;;  %s1614_s21 = smov %s1335_s7 }
 0x243   : > { %s1615_s22 = smov %s1240_s24  ;;  %s1616_s23 = smov %s1244_s25 }
 0x244   : > { %s1617_s24 = smov %s1620_s0  ;;  %s1618_s25 = smov %s1624_s27 }
 0x245   :  { %15 = sbr.rel (!%p13_p0) target bundleno = 6 (0x6), region = 126 }

</bundles_post_ra>
